<compile_context>
chip_gen: v6e
topology: v6e:2x2x1
jax: 0.10.0
libtpu: 0.0.40
codegen_flags: <defaults>
</compile_context>

<pallas_src>
import functools

import jax
import jax.numpy as jnp
import numpy as np
from jax.experimental import pallas as pl
from jax.experimental.pallas import tpu as pltpu

CHA_1, CHA_2, CHA_3 = 8, 16, 16


def _round_up(a, m):
    return -(-a // m) * m


# --------------------------------- kernel ------------------------------------

def _celu(x, alpha):
    # F.celu; clamp the exp argument so the discarded branch never produces inf.
    return jnp.where(x > 0, x, alpha * jnp.expm1(jnp.minimum(x, 0.0) / alpha))


def cnn1d_kernel(x_ref, w_ref, b_ref, o_ref, *, stage_dims, pool_dims,
                 roll_shifts):
    """Six MXU matmuls + fused activations + roll-based maxpool."""
    C3, L1 = pool_dims
    s_m1, s_p1, s_p2 = roll_shifts
    dot = functools.partial(jnp.dot, preferred_element_type=jnp.float32)

    def mm(h, i):
        # Per-stage slices are 128-aligned (full (8,128)/(16,128) tiles), so
        # they lower to plain vector loads; activations are cast to bf16 only
        # at the MXU operand (element-wise math stays f32 for v5e).
        r, c = stage_dims[i]
        return dot(h.astype(jnp.bfloat16), w_ref[i, :r, :c]) + b_ref[i:i + 1, :c]

    # batch_norm1 + dense1 (folded, columns permuted to NLC order) + CELU
    h = _celu(mm(x_ref[...], 0), 0.06)
    # batch_norm_c1 + conv1 (banded matrix) + ReLU
    h = jnp.maximum(mm(h, 1), 0.0)
    # ave_po_c1 + batch_norm_c2 + conv2 (single composed matrix) + ReLU
    h = jnp.maximum(mm(h, 2), 0.0)
    x_s = h
    # batch_norm_c2_1 + conv2_1 + ReLU
    h = jnp.maximum(mm(h, 3), 0.0)
    # batch_norm_c2_2 + conv2_2 + ReLU
    h = jnp.maximum(mm(h, 4), 0.0)

    # Residual multiply, then MaxPool1d(4, 2, padding=1) over the position axis
    # of the NLC-flat layout.  hm >= 0 (product of two ReLU outputs), so the
    # masked/zero-padded window entries behave exactly like PyTorch's -inf pad.
    hm = h * x_s
    lane = jax.lax.broadcasted_iota(jnp.int32, hm.shape, 1)
    t_m1 = jnp.where(lane >= C3, pltpu.roll(hm, s_m1, axis=1), 0.0)
    t_p1 = jnp.where(lane < (L1 - 1) * C3, pltpu.roll(hm, s_p1, axis=1), 0.0)
    t_p2 = jnp.where(lane < (L1 - 2) * C3, pltpu.roll(hm, s_p2, axis=1), 0.0)
    y = jnp.maximum(jnp.maximum(hm, t_m1), jnp.maximum(t_p1, t_p2))

    # flatten (already NLC-flat) + batch_norm3 + dense3; the "keep even
    # positions" selection of the maxpool is folded into zero rows of the
    # expanded dense3 matrix, so the store is a full lane-dense 128-wide slab.
    o_ref[...] = mm(y, 5).astype(o_ref.dtype)


# ------------------ pltpu.roll direction probe (robustness) -------------------

_ROLL_DIR = None


def _roll_direction():
    """+1 if pltpu.roll matches jnp.roll (result[l] = x[l - shift]), else -1."""
    global _ROLL_DIR
    if _ROLL_DIR is None:
        def probe(x_ref, o_ref):
            o_ref[...] = pltpu.roll(x_ref[...], 1, axis=1)

        x = jnp.broadcast_to(jnp.arange(128, dtype=jnp.float32), (8, 128))
        y = pl.pallas_call(
            probe, out_shape=jax.ShapeDtypeStruct((8, 128), jnp.float32))(x)
        _ROLL_DIR = 1 if float(y[0, 1]) == 0.0 else -1
    return _ROLL_DIR


# --------------------------------- wrapper ------------------------------------

def cnn1d_forward(x, params, batch_block=None):
    w_pack, b_pack = params["w_pack"], params["b_pack"]
    stage_dims = params["stage_dims"]
    C3, L1 = params["pool_dims"]
    T = params["num_targets"]
    F_pad = stage_dims[0][0]
    T_pad = stage_dims[5][1]
    B, F = x.shape

    if batch_block is None:
        if B <= 16:
            # Tiny batch: one grid step (splitting 16 rows gains nothing).
            batch_block = _round_up(max(B, 1), 8)
        else:
            # >=2 parallel grid steps so both v7x TensorCores get work, capped
            # at 512 rows so single-TC v5e/v6e amortize per-step overhead.
            # (On v5e, callers may prefer an explicit multiple-of-128 block.)
            batch_block = min(512, _round_up((B + 1) // 2, 8))
    else:
        batch_block = _round_up(batch_block, 8)
    B_pad = _round_up(B, batch_block)

    # Zero-pad batch rows and feature lanes; padded rows are sliced off below
    # and padded feature lanes hit zero weight rows, so results are unchanged.
    xp = jnp.pad(x.astype(jnp.float32), ((0, B_pad - B), (0, F_pad - F)))

    L_pad = stage_dims[4][1]
    d = _roll_direction()
    roll_shifts = ((d * C3) % L_pad, (-d * C3) % L_pad, (-d * 2 * C3) % L_pad)

    kern = functools.partial(cnn1d_kernel, stage_dims=stage_dims,
                             pool_dims=(C3, L1), roll_shifts=roll_shifts)
    out = pl.pallas_call(
        kern,
        out_shape=jax.ShapeDtypeStruct((B_pad, T_pad), jnp.float32),
        grid=(B_pad // batch_block,),
        in_specs=[
            pl.BlockSpec((batch_block, F_pad), lambda i: (i, 0)),
            # Constant index_map -> slabs fetched once.  Default double
            # buffering kept: at <200 KiB the Buffered(1) saving is negligible.
            pl.BlockSpec(w_pack.shape, lambda i: (0, 0, 0)),
            pl.BlockSpec(b_pack.shape, lambda i: (0, 0)),
        ],
        out_specs=pl.BlockSpec((batch_block, T_pad), lambda i: (i, 0)),
        compiler_params=pltpu.CompilerParams(
            dimension_semantics=("parallel",)),
    )(xp, w_pack, b_pack)
    return out[:B, :T]


# ------------------ original-style (PyTorch-layout) parameters ----------------

def _fold_bn(key, n, eps=1e-5):
    k1, k2, k3, k4 = jax.random.split(key, 4)
    gamma = 1.0 + 0.1 * jax.random.normal(k1, (n,), jnp.float32)
    beta = 0.1 * jax.random.normal(k2, (n,), jnp.float32)
    rmean = 0.1 * jax.random.normal(k3, (n,), jnp.float32)
    rvar = 1.0 + 0.1 * jax.random.uniform(k4, (n,), jnp.float32)
    scale = gamma / jnp.sqrt(rvar + eps)
    shift = beta - rmean * scale
    return scale, shift


def _wn_linear(key, in_f, out_f):
    # nn.utils.weight_norm(nn.Linear), default dim=0 (per output row).
    k1, k2, k3 = jax.random.split(key, 3)
    v = 0.1 * jax.random.normal(k1, (out_f, in_f), jnp.float32)
    g = 1.0 + 0.1 * jax.random.normal(k2, (out_f,), jnp.float32)
    w = g[:, None] * v / (jnp.linalg.norm(v, axis=1, keepdims=True) + 1e-12)
    b = 0.1 * jax.random.normal(k3, (out_f,), jnp.float32)
    return w, b                                      # (out, in), (out,)


def _wn_conv(key, cin, cout, k, bias):
    # nn.utils.weight_norm(nn.Conv1d, dim=None): scalar g over Frobenius norm.
    k1, k2, k3 = jax.random.split(key, 3)
    v = 0.1 * jax.random.normal(k1, (cout, cin, k), jnp.float32)
    g = 1.0 + 0.1 * jax.random.normal(k2, (), jnp.float32)
    w = g * v / (jnp.linalg.norm(v) + 1e-12)
    b = 0.1 * jax.random.normal(k3, (cout,), jnp.float32) if bias else None
    return w, b                                      # (Co, Ci, K), (Co,)|None


def make_raw_params(key, num_features, hidden_size, num_targets):
    L2 = hidden_size // CHA_1 // 2 // 2
    cha_po_2 = L2 * CHA_3
    ks = jax.random.split(key, 12)
    raw = {}
    raw["bn1_s"], raw["bn1_b"] = _fold_bn(ks[0], num_features)
    raw["w1"], raw["b1"] = _wn_linear(ks[1], num_features, hidden_size)
    raw["bnc1_s"], raw["bnc1_b"] = _fold_bn(ks[2], CHA_1)
    raw["cw1"], _ = _wn_conv(ks[3], CHA_1, CHA_2, 5, bias=False)
    raw["bnc2_s"], raw["bnc2_b"] = _fold_bn(ks[4], CHA_2)
    raw["cw2"], raw["cb2"] = _wn_conv(ks[5], CHA_2, CHA_2, 3, bias=True)
    raw["bnc21_s"], raw["bnc21_b"] = _fold_bn(ks[6], CHA_2)
    raw["cw21"], raw["cb21"] = _wn_conv(ks[7], CHA_2, CHA_2, 3, bias=True)
    raw["bnc22_s"], raw["bnc22_b"] = _fold_bn(ks[8], CHA_2)
    raw["cw22"], raw["cb22"] = _wn_conv(ks[9], CHA_2, CHA_3, 5, bias=True)
    raw["bn3_s"], raw["bn3_b"] = _fold_bn(ks[10], cha_po_2)
    raw["w3"], raw["b3"] = _wn_linear(ks[11], cha_po_2, num_targets)
    return raw


# --------------- host-side folding / composition into matmul form -------------

def _np64(a):
    return np.asarray(a).astype(np.float64)


def _conv_bn_matrix(w, conv_bias, bn_scale, bn_shift, L):
    """Per-channel BN(scale, shift) followed by Conv1d(w, bias, 'same', stride 1)
    expressed as  y_flat = x_flat @ W + b  on NLC-flattened (.., L*Ci) inputs."""
    Co, Ci, K = w.shape
    p = K // 2
    W = np.zeros((L * Ci, L * Co), np.float64)
    b = np.zeros((L * Co,), np.float64)
    if conv_bias is not None:
        b += np.tile(conv_bias, L)
    for l in range(L):                       # output position
        for k in range(K):
            j = l + k - p                    # input position (zero padded)
            if 0 <= j < L:
                W[j * Ci:(j + 1) * Ci, l * Co:(l + 1) * Co] += \
                    bn_scale[:, None] * w[:, :, k].T
                b[l * Co:(l + 1) * Co] += w[:, :, k] @ bn_shift
    return W, b


def _avgpool2_matrix(L_in, C):
    """AvgPool1d(kernel=2, stride=2) as a matrix on NLC-flattened inputs."""
    L_out = L_in // 2
    A = np.zeros((L_in * C, L_out * C), np.float64)
    for m in range(L_out):
        for c in range(C):
            A[(2 * m) * C + c, m * C + c] = 0.5
            A[(2 * m + 1) * C + c, m * C + c] = 0.5
    return A


def build_kernel_params(raw, num_features, hidden_size, num_targets):
    F, H, T = num_features, hidden_size, num_targets
    assert H % (CHA_1 * 4) == 0, "hidden_size must be a multiple of 32"
    L0 = H // CHA_1
    L1 = L0 // 2
    L2 = L1 // 2
    P = L2 * CHA_3

    # dense1: fold batch_norm1, permute columns so PyTorch's channel-major
    # reshape(B, cha_1, L0) becomes a direct NLC-flat layout.
    W1 = (_np64(raw["w1"]) * _np64(raw["bn1_s"])[None, :]).T          # (F, H)
    b1 = _np64(raw["w1"]) @ _np64(raw["bn1_b"]) + _np64(raw["b1"])
    perm = np.arange(H).reshape(CHA_1, L0).T.reshape(-1)
    W1, b1 = W1[:, perm], b1[perm]

    # batch_norm_c1 + conv1
    Wc1, bc1 = _conv_bn_matrix(_np64(raw["cw1"]), None,
                               _np64(raw["bnc1_s"]), _np64(raw["bnc1_b"]), L0)

    # ave_po_c1 + batch_norm_c2 + conv2  (one composed matrix)
    A = _avgpool2_matrix(L0, CHA_2)
    M2, bc2 = _conv_bn_matrix(_np64(raw["cw2"]), _np64(raw["cb2"]),
                              _np64(raw["bnc2_s"]), _np64(raw["bnc2_b"]), L1)
    Wc2 = A @ M2

    # batch_norm_c2_1 + conv2_1
    Wc21, bc21 = _conv_bn_matrix(_np64(raw["cw21"]), _np64(raw["cb21"]),
                                 _np64(raw["bnc21_s"]), _np64(raw["bnc21_b"]),
                                 L1)
    # batch_norm_c2_2 + conv2_2
    Wc22, bc22 = _conv_bn_matrix(_np64(raw["cw22"]), _np64(raw["cb22"]),
                                 _np64(raw["bnc22_s"]), _np64(raw["bnc22_b"]),
                                 L1)

    # batch_norm3 + dense3: fold BN, permute rows from PyTorch's channel-major
    # flatten order (c*L2 + l) to NLC-flat order (l*C3 + c), then expand to
    # L1*C3 rows with zeros on odd positions: this folds the maxpool's
    # "keep even positions" selection into the matmul, so the kernel never
    # gathers lanes after pooling.
    W3 = (_np64(raw["w3"]) * _np64(raw["bn3_s"])[None, :]).T          # (P, T)
    b3 = _np64(raw["w3"]) @ _np64(raw["bn3_b"]) + _np64(raw["b3"])
    q = np.arange(P).reshape(CHA_3, L2).T.reshape(-1)
    W3 = W3[q, :]
    W3e = np.zeros((L1 * CHA_3, T), np.float64)
    for m in range(L2):
        W3e[2 * m * CHA_3:(2 * m + 1) * CHA_3, :] = W3[m * CHA_3:(m + 1) * CHA_3, :]

    weights = [W1, Wc1, Wc2, Wc21, Wc22, W3e]
    biases = [b1, bc1, bc2, bc21, bc22, b3]

    # Per-stage (rows, cols) padded to multiples of 128 so every slab slice,
    # every activation, and the final output store are lane-/tile-aligned.
    pads = tuple((_round_up(w.shape[0], 128), _round_up(w.shape[1], 128))
                 for w in weights)
    for i in range(5):
        assert pads[i][1] == pads[i + 1][0]
    assert pads[2][1] == pads[4][1]          # residual multiply widths match

    rmax = max(r for r, _ in pads)
    cmax = max(c for _, c in pads)
    w_pack = np.zeros((len(weights), rmax, cmax), np.float32)
    b_pack = np.zeros((len(biases), cmax), np.float32)
    for i, (wm, bv) in enumerate(zip(weights, biases)):
        w_pack[i, :wm.shape[0], :wm.shape[1]] = wm
        b_pack[i, :bv.shape[0]] = bv

    return {
        "w_pack": jnp.asarray(w_pack).astype(jnp.bfloat16),   # MXU operands
        "b_pack": jnp.asarray(b_pack),                        # f32 bias adds
        "stage_dims": pads,
        "pool_dims": (CHA_3, L1),
        "num_targets": T,
        "weights_f64": weights,
        "biases_f64": biases,
    }


# --------------------------- pure NumPy references -----------------------------

def reference_forward(x, raw):
    """Literal (un-folded) PyTorch eval-mode math in float64."""
    f = _np64

    def celu(v, a):
        return np.where(v > 0, v, a * np.expm1(np.minimum(v, 0.0) / a))

    def conv1d(h, wgt, bias, pad):                 # h: (B,Ci,L), wgt: (Co,Ci,K)
        B, Ci, L = h.shape
        Co, _, K = wgt.shape
        hp = np.zeros((B, Ci, L + 2 * pad), np.float64)
        hp[:, :, pad:pad + L] = h
        out = np.zeros((B, Co, L), np.float64)
        for k in range(K):
            out += np.einsum("bcl,oc->bol", hp[:, :, k:k + L], wgt[:, :, k])
        if bias is not None:
            out += bias[None, :, None]
        return out

    h = f(x) * f(raw["bn1_s"])[None] + f(raw["bn1_b"])[None]
    h = celu(h @ f(raw["w1"]).T + f(raw["b1"])[None], 0.06)
    B = h.shape[0]
    h = h.reshape(B, CHA_1, -1)                                    # (B, C, L)
    h = h * f(raw["bnc1_s"])[None, :, None] + f(raw["bnc1_b"])[None, :, None]
    h = np.maximum(conv1d(h, f(raw["cw1"]), None, 2), 0.0)
    h = h.reshape(B, CHA_2, -1, 2).mean(-1)                        # avg pool 2/2
    h = h * f(raw["bnc2_s"])[None, :, None] + f(raw["bnc2_b"])[None, :, None]
    h = np.maximum(conv1d(h, f(raw["cw2"]), f(raw["cb2"]), 1), 0.0)
    x_s = h
    h = h * f(raw["bnc21_s"])[None, :, None] + f(raw["bnc21_b"])[None, :, None]
    h = np.maximum(conv1d(h, f(raw["cw21"]), f(raw["cb21"]), 1), 0.0)
    h = h * f(raw["bnc22_s"])[None, :, None] + f(raw["bnc22_b"])[None, :, None]
    h = np.maximum(conv1d(h, f(raw["cw22"]), f(raw["cb22"]), 2), 0.0)
    h = h * x_s
    _, C, L = h.shape                                              # max pool 4/2/1
    hp = np.full((B, C, L + 2), -np.inf, np.float64)
    hp[:, :, 1:1 + L] = h
    h = np.stack([hp[:, :, 2 * m:2 * m + 4].max(-1)
                  for m in range((L + 2 - 4) // 2 + 1)], axis=-1)
    h = h.reshape(B, -1)                                           # PyTorch flatten
    h = h * f(raw["bn3_s"])[None] + f(raw["bn3_b"])[None]
    return h @ f(raw["w3"]).T + f(raw["b3"])[None]


def _quant_bf16(a):
    """f64 value of the bf16 rounding of a (via f32), matching the kernel path."""
    a32 = jnp.asarray(np.asarray(a, np.float32))
    return np.asarray(a32.astype(jnp.bfloat16).astype(jnp.float32), np.float64)


def folded_forward(x, weights, biases, C3, L1, quantize):
    """NumPy f64 emulation of the folded matmul chain the kernel executes.

    quantize=True reproduces the kernel's operand dtypes (bf16 weights and dot
    inputs, f32 biases); quantize=False is the pure f64 folded math used to
    validate the folding itself against the raw PyTorch reference."""
    qw = _quant_bf16 if quantize else _np64
    qa = _quant_bf16 if quantize else (lambda a: np.asarray(a, np.float64))
    W = [qw(w) for w in weights]
    bs = [np.asarray(np.asarray(b, np.float32), np.float64) for b in biases]

    def celu(v, a):
        return np.where(v > 0, v, a * np.expm1(np.minimum(v, 0.0) / a))

    h = celu(qa(x) @ W[0] + bs[0], 0.06)
    h = np.maximum(qa(h) @ W[1] + bs[1], 0.0)
    h = np.maximum(qa(h) @ W[2] + bs[2], 0.0)
    x_s = h
    h = np.maximum(qa(h) @ W[3] + bs[3], 0.0)
    h = np.maximum(qa(h) @ W[4] + bs[4], 0.0)
    hm = (h * x_s).reshape(x.shape[0], L1, C3)
    pooled = []
    for m in range(L1 // 2):                       # MaxPool1d(4, 2, padding=1)
        lo, hi = max(2 * m - 1, 0), min(2 * m + 2, L1 - 1)
        pooled.append(hm[:, lo:hi + 1, :].max(axis=1))
    y = np.stack(pooled, axis=1).reshape(x.shape[0], -1)
    W3_even = W[5].reshape(L1, C3, -1)[0::2].reshape((L1 // 2) * C3, -1)
    return qa(y) @ W3_even + bs[5]


# ----------------------------------- main -------------------------------------

if __name__ == "__main__":
    # Small shapes consistent with the module; hidden_size must be a multiple
    # of cha_1 * 4 = 32 so both pooling stages stay integral.
    B, num_features, hidden_size, num_targets = 16, 32, 64, 8

    key = jax.random.PRNGKey(0)
    kx, kp = jax.random.split(key)
    x = jax.random.normal(kx, (B, num_features), jnp.float32)

    raw = make_raw_params(kp, num_features, hidden_size, num_targets)
    params = build_kernel_params(raw, num_features, hidden_size, num_targets)

    out = jax.block_until_ready(cnn1d_forward(x, params))

    x_np = np.asarray(x)
    C3, L1 = params["pool_dims"]
    # Check A: the host-side folding / permutations / pool reformulation (f64)
    # exactly reproduce the literal un-folded PyTorch eval math.
    ref_raw = reference_forward(x_np, raw)
    ref_fold = folded_forward(x_np, params["weights_f64"],
                              params["biases_f64"], C3, L1, quantize=False)
    np.testing.assert_allclose(ref_fold, ref_raw, rtol=1e-6, atol=1e-8)
    # Check B: the kernel matches an f64 emulation of its exact bf16/f32 math
    # (validates layout, padding, roll direction and masks).
    ref_q = folded_forward(x_np, params["weights_f64"],
                           params["biases_f64"], C3, L1, quantize=True)
    np.testing.assert_allclose(np.asarray(out), ref_q, rtol=2e-3, atol=2e-3)

    # TODO(synk): training-time pieces (Dropout sampling, BatchNorm batch
    # statistics, BCEWithLogitsLoss / Adam / OneCycleLR in fit()) have no
    # inference-kernel equivalent and are omitted.
    print("KERNEL_OK")
</pallas_src>

<mosaic_0001>
module attributes {stable_mosaic.version = 11 : i64} {
  func.func @probe(%arg0: memref<8x128xf32, #tpu.memory_space<vmem>>, %arg1: memref<8x128xf32, #tpu.memory_space<vmem>>) attributes {dimension_semantics = [], scalar_prefetch = 0 : i64, scratch_operands = 0 : i64, tpu.core_type = #tpu.core_type<tc>} {
    %c0 = arith.constant 0 : index
    %c0_0 = arith.constant 0 : index
    %0 = vector.load %arg0[%c0, %c0_0] : memref<8x128xf32, #tpu.memory_space<vmem>>, vector<8x128xf32>
    %c1_i32 = arith.constant 1 : i32
    %1 = tpu.dynamic_rotate %0 by %c1_i32 dim 1 : vector<8x128xf32>, i32 -> vector<8x128xf32>
    %c0_1 = arith.constant 0 : index
    %c0_2 = arith.constant 0 : index
    %2 = vector.load %arg1[%c0_1, %c0_2] : memref<8x128xf32, #tpu.memory_space<vmem>>, vector<8x128xf32>
    tpu.vector_store %arg1[%c0_1, %c0_2], %1 {strides = array<i32>} : memref<8x128xf32, #tpu.memory_space<vmem>>, vector<8x128xf32>,
    return
  }
}

</mosaic_0001>

<bundles_post_ra>
// kernel: tpu_custom_call.1
= control target key start
LH: loop header
LB: loop body
LE: loop exit
PB: predicated region body
PF: predicated region fallthrough
CT: control target
= control target key end

     0   :  { %6 = vsyncpa [#allocation3], 0  ;;  %s106_s0 = inlined_call_operand.hbm [shape: f32[8,128], index: 0, kind: input, shape index: {}]   ;;  %s107_s1 = inlined_call_operand.hbm [shape: f32[8,128], index: 1, kind: output, shape index: {}]  }
   0x1   :  { %7 = vsyncpa [#allocation4], 0  ;;  %s87_s6 = smov [#allocation2]  }
   0x2   :  { %s14_s7 = sshll.u32 %s87_s6, 4  ;;  %s15_s7 = int_to_ptr.vmem [resolvable:$true] %s14_s7 }
   0x3   :  { %s51_s8 = scalar_lea.vmem %s15_s7, 128  ;;  %p56_p1 = scmp.lt.s32.totalorder %s15_s7, %s15_s7 }
   0x4   :  { %p52_p0 = scmp.ne.s32.totalorder %s15_s7, %s51_s8  ;;  %p57_p2 = scmp.lt.s32.totalorder %s51_s8, %s51_s8 }
   0x6   :  { %p58_p3 = por %p57_p2, %p56_p1 }
   0x8   :  { %p59_p4 = pnand %p58_p3, %p52_p0 }
   0xa   :  { %62 = shalt.err (!%p59_p4)
}
   0xb   :  { %17 = dma.hbm_to_vmem [thread:$0]  %s106_s0, 128, %s15_s7, [#allocation3]  }
   0xc   :  { %83 = dma.done.wait [#allocation3], 128  }
   0xd   :  { %84 = vsyncadd [#allocation3], 4294967168  ;;  %v21_v0 = vld [vmem:[#allocation2] sm:$0xff]  ;;  %s88_s11 = smov 1   ;;  %s89_s12 = smov [#allocation5]  }
   0xe   :  { %22 = vrot.lane.b32.xlu0 %v21_v0, %s88_s11  ;;  %s31_s13 = sshll.u32 %s89_s12, 4  ;;  %s32_s13 = int_to_ptr.vmem [resolvable:$true] %s31_s13 }
   0xf   :  { %s63_s14 = scalar_lea.vmem %s32_s13, 128  ;;  %p68_p6 = scmp.lt.s32.totalorder %s32_s13, %s32_s13 }
  0x10   :  { %p64_p5 = scmp.ne.s32.totalorder %s32_s13, %s63_s14  ;;  %p69_p7 = scmp.lt.s32.totalorder %s63_s14, %s63_s14 }
  0x12   :  { %p70_p8 = por %p69_p7, %p68_p6 }
  0x14   :  { %p71_p9 = pnand %p70_p8, %p64_p5 }
  0x80   :  { %v23_v1 = vpop.permute.xlu0 %22 }
  0x81   :  { %24 = vst [vmem:[#allocation5] sm:$0xff] %v23_v1 }
  0x82   :  { %74 = shalt.err (!%p71_p9)
}
  0x83   :  { %34 = dma.vmem_to_hbm [thread:$0]  %s32_s13, 128, %s107_s1, [#allocation4]  }
  0x84   :  { %85 = dma.done.wait [#allocation4], 128  }
  0x85   :  { %86 = vsyncadd [#allocation4], 4294967168 }
  0x86   :  { %38 = vsyncpa [#allocation3], 1 }
  0x87   :  { %39 = vsyncpa [#allocation4], 1 }

</bundles_post_ra>
